<compile_context>
chip_gen: v7x
topology: tpu7x:2x2x1
jax: 0.10.0
libtpu: 0.0.40
codegen_flags: <defaults>
</compile_context>

<pallas_src>
import jax
import jax.numpy as jnp
from jax import lax
from jax.experimental import pallas as pl
from jax.experimental.pallas import tpu as pltpu

EMBED_DIM = 128          # embedding dim (sublane axis inside the kernel)
MIN_Q_TILE = 128         # lane-dense minimum
MAX_Q_TILE = 1024        # amortizes per-step overhead; working set still << scoped VMEM
EPS = 1e-8               # nn.CosineSimilarity default eps
_NORM_TINY = 1e-30       # guard for rsqrt in DirectEncoder normalization
PARAM_DTYPE = jnp.bfloat16


# --------------------------------- kernels -----------------------------------

def _l2n(x32, out_dtype=None):
    """DirectEncoder: L2-normalize columns (dim 0) in f32; optionally cast for the MXU."""
    ss = jnp.sum(x32 * x32, axis=0, keepdims=True)
    y = x32 * lax.rsqrt(jnp.maximum(ss, _NORM_TINY))
    return y if out_dtype is None else y.astype(out_dtype)


def _cosine_row(num, sum_sq):
    """cos over dim 0 when the other operand is unit-norm: one EUP rsqrt, clamped at EPS."""
    return num * lax.rsqrt(jnp.maximum(sum_sq, EPS * EPS))


def _chain_kernel(target_ref, anchor_ref, rels_t_ref, out_ref):
    """'1/2/3-chain': act = (t.T @ M_r1 @ ...).T computed as M_rk.T @ ... @ M_r1.T @ t."""
    t = _l2n(target_ref[...].astype(jnp.float32))                 # [d, q] f32, |t|=1
    a = _l2n(anchor_ref[...].astype(jnp.float32))                 # [d, q] f32, |a|=1
    act = t
    for i in range(rels_t_ref.shape[0]):                          # static unroll (<=3 rels)
        # bf16 x bf16 MXU pass, f32 accumulation.
        act = jnp.dot(rels_t_ref[i], act.astype(jnp.bfloat16),
                      preferred_element_type=jnp.float32)
    num = jnp.sum(act * a, axis=0, keepdims=True)                 # [1, q]
    ss = jnp.sum(act * act, axis=0, keepdims=True)
    out_ref[...] = _cosine_row(num, ss)


def _inter2_packed_kernel(target_ref, a1_ref, a2_ref, rbd_ref, wprebd_ref, wpost_ref,
                          out_ref):
    """'2-inter' with block-diagonal [2d,2d] packing (full-width 256 MXU passes)."""
    d = target_ref.shape[0]
    t = _l2n(target_ref[...].astype(jnp.float32))                 # [d, q] f32, |t|=1
    e1 = _l2n(a1_ref[...].astype(jnp.float32), jnp.bfloat16)      # [d, q] bf16
    e2 = _l2n(a2_ref[...].astype(jnp.float32), jnp.bfloat16)
    e12 = jnp.concatenate([e1, e2], axis=0)                       # [2d, q] bf16 (aligned sublane concat)
    # [r1@e1 ; r2@e2] in one 256-wide pass.
    p12 = jnp.dot(rbd_ref[...], e12, preferred_element_type=jnp.float32)
    # [relu(Wpre@p1) ; relu(Wpre@p2)] in one 256-wide pass.
    h = jnp.maximum(jnp.dot(wprebd_ref[...], p12.astype(jnp.bfloat16),
                            preferred_element_type=jnp.float32), 0.0)
    comb = jnp.minimum(h[:d], h[d:])                              # SetIntersection(min)
    qi = jnp.dot(wpost_ref[...], comb.astype(jnp.bfloat16),
                 preferred_element_type=jnp.float32)
    num = jnp.sum(t * qi, axis=0, keepdims=True)
    ss = jnp.sum(qi * qi, axis=0, keepdims=True)
    out_ref[...] = _cosine_row(num, ss)


def _inter2_split_kernel(target_ref, a1_ref, a2_ref, r1_ref, r2_ref, wpre_ref, wpost_ref,
                         out_ref):
    """'2-inter' with separate 128-wide dots (v5e MXU is 4x128x128; no zero-block waste,
    and no lane-axis concatenate)."""
    t = _l2n(target_ref[...].astype(jnp.float32))
    e1 = _l2n(a1_ref[...].astype(jnp.float32), jnp.bfloat16)
    e2 = _l2n(a2_ref[...].astype(jnp.float32), jnp.bfloat16)
    p1 = jnp.dot(r1_ref[...], e1, preferred_element_type=jnp.float32)
    p2 = jnp.dot(r2_ref[...], e2, preferred_element_type=jnp.float32)
    h1 = jnp.maximum(jnp.dot(wpre_ref[...], p1.astype(jnp.bfloat16),
                             preferred_element_type=jnp.float32), 0.0)
    h2 = jnp.maximum(jnp.dot(wpre_ref[...], p2.astype(jnp.bfloat16),
                             preferred_element_type=jnp.float32), 0.0)
    comb = jnp.minimum(h1, h2)
    qi = jnp.dot(wpost_ref[...], comb.astype(jnp.bfloat16),
                 preferred_element_type=jnp.float32)
    num = jnp.sum(t * qi, axis=0, keepdims=True)
    ss = jnp.sum(qi * qi, axis=0, keepdims=True)
    out_ref[...] = _cosine_row(num, ss)


# --------------------------------- wrappers ----------------------------------

def _pick_q_tile(n):
    """Biggest lane-dense tile that still leaves >=2 'parallel' tiles (v7x megacore)."""
    n128 = -(-n // MIN_Q_TILE) * MIN_Q_TILE
    t = (n128 // 2 // MIN_Q_TILE) * MIN_Q_TILE
    return max(MIN_Q_TILE, min(MAX_Q_TILE, t))


def chain_scores(target, anchor, rel_t_stack, *, q_tile):
    """target/anchor: [d, n_pad] bf16 (raw); rel_t_stack: [R, d, d] bf16, pre-transposed."""
    d, n_pad = target.shape
    r = rel_t_stack.shape[0]
    emb_spec = pl.BlockSpec((d, q_tile), lambda i: (0, i))
    out = pl.pallas_call(
        _chain_kernel,
        out_shape=jax.ShapeDtypeStruct((1, n_pad), jnp.float32),
        grid_spec=pltpu.PrefetchScalarGridSpec(
            num_scalar_prefetch=0,
            grid=(n_pad // q_tile,),
            in_specs=[emb_spec, emb_spec,
                      pl.BlockSpec((r, d, d), lambda i: (0, 0, 0))],   # VMEM-resident
            out_specs=pl.BlockSpec((1, q_tile), lambda i: (0, i)),     # lane-dense
        ),
        compiler_params=pltpu.CompilerParams(dimension_semantics=("parallel",)),
    )(target, anchor, rel_t_stack)
    return out[0]


def inter2_scores_packed(target, a1, a2, rbd, wpre_bd, wpost, *, q_tile):
    d, n_pad = target.shape
    emb_spec = pl.BlockSpec((d, q_tile), lambda i: (0, i))
    out = pl.pallas_call(
        _inter2_packed_kernel,
        out_shape=jax.ShapeDtypeStruct((1, n_pad), jnp.float32),
        grid_spec=pltpu.PrefetchScalarGridSpec(
            num_scalar_prefetch=0,
            grid=(n_pad // q_tile,),
            in_specs=[emb_spec, emb_spec, emb_spec,
                      pl.BlockSpec((2 * d, 2 * d), lambda i: (0, 0)),  # blockdiag(r1, r2)
                      pl.BlockSpec((2 * d, 2 * d), lambda i: (0, 0)),  # blockdiag(Wpre, Wpre)
                      pl.BlockSpec((d, d), lambda i: (0, 0))],         # Wpost
            out_specs=pl.BlockSpec((1, q_tile), lambda i: (0, i)),
        ),
        compiler_params=pltpu.CompilerParams(dimension_semantics=("parallel",)),
    )(target, a1, a2, rbd, wpre_bd, wpost)
    return out[0]


def inter2_scores_split(target, a1, a2, r1, r2, wpre, wpost, *, q_tile):
    d, n_pad = target.shape
    emb_spec = pl.BlockSpec((d, q_tile), lambda i: (0, i))
    w_spec = pl.BlockSpec((d, d), lambda i: (0, 0))
    out = pl.pallas_call(
        _inter2_split_kernel,
        out_shape=jax.ShapeDtypeStruct((1, n_pad), jnp.float32),
        grid_spec=pltpu.PrefetchScalarGridSpec(
            num_scalar_prefetch=0,
            grid=(n_pad // q_tile,),
            in_specs=[emb_spec, emb_spec, emb_spec, w_spec, w_spec, w_spec, w_spec],
            out_specs=pl.BlockSpec((1, q_tile), lambda i: (0, i)),
        ),
        compiler_params=pltpu.CompilerParams(dimension_semantics=("parallel",)),
    )(target, a1, a2, r1, r2, wpre, wpost)
    return out[0]


# ------------------------- module-level orchestration ------------------------

def _reverse_relation(rel):
    return (rel[-1], rel[1], rel[0])


def _blockdiag(a, b):
    d = a.shape[0]
    z = jnp.zeros((d, d), a.dtype)
    return jnp.block([[a, z], [z, b]])


class Formula:
    def __init__(self, query_type, rels):
        self.query_type = query_type
        self.rels = rels
        self.target_mode = rels[0][0]
        if "chain" in query_type and "inter" not in query_type:
            self.anchor_modes = (rels[-1][-1],)
        else:
            self.anchor_modes = tuple(r[-1] for r in rels)


class Query:
    def __init__(self, anchor_nodes):
        self.anchor_nodes = anchor_nodes


class QueryEncoderDecoderPallas:
    """JAX/Pallas reimplementation of QueryEncoderDecoder.forward (scoring paths)."""

    def __init__(self, embed_tables, rel_mats, pre_mats, post_mats, pack_inter=True):
        # Parameters stored once in bf16 (halves HBM traffic; MXU runs native bf16).
        # Embedding tables stored column-major [d, n_nodes] -> gather needs no transpose.
        self.embed_tables_T = {m: v.T.astype(PARAM_DTYPE) for m, v in embed_tables.items()}
        self.rel_mats = {k: v.astype(PARAM_DTYPE) for k, v in rel_mats.items()}
        self.rel_mats_T = {k: v.T.astype(PARAM_DTYPE) for k, v in rel_mats.items()}
        self.pre_mats = {m: v.astype(PARAM_DTYPE) for m, v in pre_mats.items()}
        self.post_mats = {m: v.astype(PARAM_DTYPE) for m, v in post_mats.items()}
        # pack_inter=True: block-diagonal 256-wide MXU packing (best on v6e/v7x).
        # Set False on v5e (4x128x128 MXU would waste passes on the zero blocks).
        self.pack_inter = pack_inter
        self._chain_stacks = {}   # formula.rels -> stacked transposed relation mats
        self._inter_packed = {}   # (rels, mode)  -> (blockdiag(r1,r2), blockdiag(Wpre,Wpre))

    def _enc_raw(self, nodes, mode, n_pad):
        # TODO(synk): fold this gather into the kernel DMA pipeline (scalar-prefetched
        # indices + manual row DMA); kept as host-side XLA column-gather for now.
        nodes = list(nodes)
        nodes = nodes + [nodes[0]] * (n_pad - len(nodes))   # pad with a real node -> no NaN
        idx = jnp.asarray(nodes, dtype=jnp.int32)
        return self.embed_tables_T[mode][:, idx]             # [d, n_pad], bf16, no transpose

    def _chain_rel_stack(self, rels):
        if rels not in self._chain_stacks:                    # hoisted: stacked once per formula
            self._chain_stacks[rels] = jnp.stack([self.rel_mats_T[r] for r in rels])
        return self._chain_stacks[rels]

    def _inter_packed_mats(self, formula):
        key = (formula.rels, formula.target_mode)
        if key not in self._inter_packed:
            r1 = self.rel_mats[_reverse_relation(formula.rels[0])]
            r2 = self.rel_mats[_reverse_relation(formula.rels[1])]
            wpre = self.pre_mats[formula.target_mode]
            self._inter_packed[key] = (_blockdiag(r1, r2), _blockdiag(wpre, wpre))
        return self._inter_packed[key]

    def forward(self, formula, queries, target_nodes, neg_nodes=None, neg_lengths=None):
        # Negative samples are folded into the SAME kernel launch (batches the query axis).
        if neg_nodes is not None:
            target_nodes = list(target_nodes) + list(neg_nodes)
            queries = list(queries) + [b for i, b in enumerate(queries)
                                       for _ in range(neg_lengths[i])]
        n = len(target_nodes)
        q_tile = _pick_q_tile(n)
        n_pad = -(-n // q_tile) * q_tile
        qt = formula.query_type
        if qt in ("1-chain", "2-chain", "3-chain"):
            target = self._enc_raw(target_nodes, formula.target_mode, n_pad)
            anchor = self._enc_raw([q.anchor_nodes[0] for q in queries],
                                   formula.anchor_modes[0], n_pad)
            rel_t_stack = self._chain_rel_stack(formula.rels)
            return chain_scores(target, anchor, rel_t_stack, q_tile=q_tile)[:n]
        elif qt == "2-inter":
            target = self._enc_raw(target_nodes, formula.target_mode, n_pad)
            a1 = self._enc_raw([q.anchor_nodes[0] for q in queries],
                               formula.anchor_modes[0], n_pad)
            a2 = self._enc_raw([q.anchor_nodes[1] for q in queries],
                               formula.anchor_modes[1], n_pad)
            wpost = self.post_mats[formula.target_mode]
            if self.pack_inter:
                rbd, wpre_bd = self._inter_packed_mats(formula)
                return inter2_scores_packed(target, a1, a2, rbd, wpre_bd, wpost,
                                            q_tile=q_tile)[:n]
            r1 = self.rel_mats[_reverse_relation(formula.rels[0])]
            r2 = self.rel_mats[_reverse_relation(formula.rels[1])]
            wpre = self.pre_mats[formula.target_mode]
            return inter2_scores_split(target, a1, a2, r1, r2, wpre, wpost,
                                       q_tile=q_tile)[:n]
        else:
            # TODO(synk): '3-inter', '3-inter_chain', '3-chain_inter' variants (third anchor /
            # two-hop projection / post-intersection projection) not wired up here.
            raise NotImplementedError(qt)


# ----------------------------- pure-JAX references ---------------------------

def _ref_chain(target, anchor, rel_stack):
    t = target / jnp.linalg.norm(target, axis=0, keepdims=True)
    a = anchor / jnp.linalg.norm(anchor, axis=0, keepdims=True)
    act = t.T
    for i in range(rel_stack.shape[0]):
        act = act @ rel_stack[i]
    act = act.T
    num = jnp.sum(act * a, axis=0)
    den = jnp.maximum(jnp.linalg.norm(act, axis=0) * jnp.linalg.norm(a, axis=0), EPS)
    return num / den


def _ref_inter2(target, a1, a2, r1, r2, wpre, wpost):
    t = target / jnp.linalg.norm(target, axis=0, keepdims=True)
    e1 = a1 / jnp.linalg.norm(a1, axis=0, keepdims=True)
    e2 = a2 / jnp.linalg.norm(a2, axis=0, keepdims=True)
    e1, e2 = r1 @ e1, r2 @ e2
    comb = jnp.minimum(jnp.maximum(wpre @ e1, 0.0), jnp.maximum(wpre @ e2, 0.0))
    qi = wpost @ comb
    num = jnp.sum(t * qi, axis=0)
    den = jnp.maximum(jnp.linalg.norm(t, axis=0) * jnp.linalg.norm(qi, axis=0), EPS)
    return num / den


# ------------------------------------ main ------------------------------------

if __name__ == "__main__":
    d = EMBED_DIM
    key = jax.random.PRNGKey(0)
    ks = jax.random.split(key, 12)

    # Deterministic synthetic "graph" parameters.
    embed_tables = {
        "user": jax.random.normal(ks[0], (32, d), jnp.float32),
        "item": jax.random.normal(ks[1], (40, d), jnp.float32),
    }
    rel_keys = [
        ("user", "likes", "item"), ("item", "likes", "user"),
        ("item", "made_by", "user"), ("user", "made_by", "item"),
    ]
    rel_mats = {r: 0.1 * jax.random.normal(ks[2 + i], (d, d), jnp.float32)
                for i, r in enumerate(rel_keys)}
    pre_mats = {"user": 0.1 * jax.random.normal(ks[6], (d, d), jnp.float32),
                "item": 0.1 * jax.random.normal(ks[7], (d, d), jnp.float32)}
    post_mats = {"user": 0.1 * jax.random.normal(ks[8], (d, d), jnp.float32),
                 "item": 0.1 * jax.random.normal(ks[9], (d, d), jnp.float32)}

    model = QueryEncoderDecoderPallas(embed_tables, rel_mats, pre_mats, post_mats)

    # References use the model's bf16-stored params upcast to f32, so the check isolates
    # kernel semantics (bf16 MXU operands -> tolerance 1e-2 vs the f32-arithmetic reference).
    def gather_f32(mode, nodes):
        return model.embed_tables_T[mode][:, jnp.asarray(nodes, jnp.int32)].astype(jnp.float32)

    def rel_f32(r):
        return model.rel_mats[r].astype(jnp.float32)

    ATOL = 1e-2
    n_pos = 96
    neg_lengths = [1] * n_pos   # one negative per query -> 192 scored pairs, padded to 256

    # ---- 2-chain query: user --likes--> item --made_by--> user (with negatives) ----
    f_chain = Formula("2-chain", (("user", "likes", "item"), ("item", "made_by", "user")))
    chain_queries = [Query((i % 32,)) for i in range(n_pos)]
    chain_targets = [(3 * i + 1) % 32 for i in range(n_pos)]
    chain_negs = [(5 * i + 7) % 32 for i in range(n_pos)]
    s_chain = model.forward(f_chain, chain_queries, chain_targets,
                            neg_nodes=chain_negs, neg_lengths=neg_lengths)
    s_chain = jax.block_until_ready(s_chain)

    all_targets = chain_targets + chain_negs
    all_queries = chain_queries + chain_queries
    tgt = gather_f32(f_chain.target_mode, all_targets)
    anc = gather_f32(f_chain.anchor_modes[0], [q.anchor_nodes[0] for q in all_queries])
    ref = _ref_chain(tgt, anc, jnp.stack([rel_f32(r) for r in f_chain.rels]))
    assert s_chain.shape == (len(all_targets),)
    assert jnp.allclose(s_chain, ref, atol=ATOL), float(jnp.max(jnp.abs(s_chain - ref)))

    # ---- 2-inter query: item<-likes-user  AND  item<-made_by-user (with negatives) ----
    f_inter = Formula("2-inter", (("item", "likes", "user"), ("item", "made_by", "user")))
    inter_queries = [Query((i % 32, (2 * i + 5) % 32)) for i in range(n_pos)]
    inter_targets = [(7 * i + 2) % 40 for i in range(n_pos)]
    inter_negs = [(11 * i + 3) % 40 for i in range(n_pos)]

    all_targets = inter_targets + inter_negs
    all_queries = inter_queries + inter_queries
    tgt = gather_f32(f_inter.target_mode, all_targets)
    a1 = gather_f32(f_inter.anchor_modes[0], [q.anchor_nodes[0] for q in all_queries])
    a2 = gather_f32(f_inter.anchor_modes[1], [q.anchor_nodes[1] for q in all_queries])
    ref = _ref_inter2(tgt, a1, a2,
                      rel_f32(_reverse_relation(f_inter.rels[0])),
                      rel_f32(_reverse_relation(f_inter.rels[1])),
                      model.pre_mats["item"].astype(jnp.float32),
                      model.post_mats["item"].astype(jnp.float32))

    # packed (block-diagonal, v6e/v7x path)
    model.pack_inter = True
    s_inter_p = jax.block_until_ready(
        model.forward(f_inter, inter_queries, inter_targets,
                      neg_nodes=inter_negs, neg_lengths=neg_lengths))
    assert s_inter_p.shape == (len(all_targets),)
    assert jnp.allclose(s_inter_p, ref, atol=ATOL), float(jnp.max(jnp.abs(s_inter_p - ref)))

    # split (v5e path)
    model.pack_inter = False
    s_inter_s = jax.block_until_ready(
        model.forward(f_inter, inter_queries, inter_targets,
                      neg_nodes=inter_negs, neg_lengths=neg_lengths))
    assert s_inter_s.shape == (len(all_targets),)
    assert jnp.allclose(s_inter_s, ref, atol=ATOL), float(jnp.max(jnp.abs(s_inter_s - ref)))

    print("KERNEL_OK")
</pallas_src>

<mosaic_0001>
module attributes {stable_mosaic.version = 11 : i64} {
  func.func @_chain_kernel(%arg0: i32, %arg1: memref<128x128xbf16, #tpu.memory_space<vmem>>, %arg2: memref<128x128xbf16, #tpu.memory_space<vmem>>, %arg3: memref<2x128x128xbf16, #tpu.memory_space<vmem>>, %arg4: memref<1x128xf32, #tpu.memory_space<vmem>>) attributes {dimension_semantics = [#tpu.dimension_semantics<parallel>], iteration_bounds = array<i64: 2>, scalar_prefetch = 0 : i64, scratch_operands = 0 : i64, tpu.core_type = #tpu.core_type<tc>, window_params = [{transform_indices = @transform_0, window_bounds = array<i64: 128, 128>}, {transform_indices = @transform_1, window_bounds = array<i64: 128, 128>}, {pipeline_mode = #tpu.pipeline_mode<synchronous>, transform_indices = @transform_2, window_bounds = array<i64: 2, 128, 128>}, {transform_indices = @transform_3, window_bounds = array<i64: 1, 128>}]} {
    %c0 = arith.constant 0 : index
    %c0_0 = arith.constant 0 : index
    %0 = vector.load %arg1[%c0, %c0_0] : memref<128x128xbf16, #tpu.memory_space<vmem>>, vector<128x128xbf16>
    %1 = arith.extf %0 : vector<128x128xbf16> to vector<128x128xf32>
    %2 = arith.mulf %1, %1 : vector<128x128xf32>
    %cst = arith.constant dense<0.000000e+00> : vector<128xf32>
    %3 = vector.multi_reduction <add>, %2, %cst [0] : vector<128x128xf32> to vector<128xf32>
    %4 = vector.shape_cast %3 : vector<128xf32> to vector<1x128xf32>
    %cst_1 = arith.constant 1.000000e-30 : f32
    %5 = vector.broadcast %cst_1 : f32 to vector<1x128xf32>
    %6 = arith.maximumf %4, %5 : vector<1x128xf32>
    %7 = math.rsqrt %6 : vector<1x128xf32>
    %8 = vector.broadcast %7 : vector<1x128xf32> to vector<128x128xf32>
    %9 = arith.mulf %1, %8 : vector<128x128xf32>
    %c0_2 = arith.constant 0 : index
    %c0_3 = arith.constant 0 : index
    %10 = vector.load %arg2[%c0_2, %c0_3] : memref<128x128xbf16, #tpu.memory_space<vmem>>, vector<128x128xbf16>
    %11 = arith.extf %10 : vector<128x128xbf16> to vector<128x128xf32>
    %12 = arith.mulf %11, %11 : vector<128x128xf32>
    %cst_4 = arith.constant dense<0.000000e+00> : vector<128xf32>
    %13 = vector.multi_reduction <add>, %12, %cst_4 [0] : vector<128x128xf32> to vector<128xf32>
    %14 = vector.shape_cast %13 : vector<128xf32> to vector<1x128xf32>
    %cst_5 = arith.constant 1.000000e-30 : f32
    %15 = vector.broadcast %cst_5 : f32 to vector<1x128xf32>
    %16 = arith.maximumf %14, %15 : vector<1x128xf32>
    %17 = math.rsqrt %16 : vector<1x128xf32>
    %18 = vector.broadcast %17 : vector<1x128xf32> to vector<128x128xf32>
    %19 = arith.mulf %11, %18 : vector<128x128xf32>
    %c0_6 = arith.constant 0 : index
    %c0_7 = arith.constant 0 : index
    %c0_8 = arith.constant 0 : index
    %20 = vector.load %arg3[%c0_6, %c0_7, %c0_8] : memref<2x128x128xbf16, #tpu.memory_space<vmem>>, vector<1x128x128xbf16>
    %21 = vector.shape_cast %20 : vector<1x128x128xbf16> to vector<128x128xbf16>
    %22 = arith.truncf %9 : vector<128x128xf32> to vector<128x128xbf16>
    %cst_9 = arith.constant dense<0.000000e+00> : vector<128x128xf32>
    %23 = tpu.matmul %21, %22, %cst_9 {dimension_numbers = #tpu.dot_dimension_numbers<[1], [0], [0], [1], [0, 0, 1, 1], [], []>} : vector<128x128xbf16>, vector<128x128xbf16>, vector<128x128xf32> -> vector<128x128xf32>
    %c1 = arith.constant 1 : index
    %c0_10 = arith.constant 0 : index
    %c0_11 = arith.constant 0 : index
    %24 = vector.load %arg3[%c1, %c0_10, %c0_11] : memref<2x128x128xbf16, #tpu.memory_space<vmem>>, vector<1x128x128xbf16>
    %25 = vector.shape_cast %24 : vector<1x128x128xbf16> to vector<128x128xbf16>
    %26 = arith.truncf %23 : vector<128x128xf32> to vector<128x128xbf16>
    %cst_12 = arith.constant dense<0.000000e+00> : vector<128x128xf32>
    %27 = tpu.matmul %25, %26, %cst_12 {dimension_numbers = #tpu.dot_dimension_numbers<[1], [0], [0], [1], [0, 0, 1, 1], [], []>} : vector<128x128xbf16>, vector<128x128xbf16>, vector<128x128xf32> -> vector<128x128xf32>
    %28 = arith.mulf %27, %19 : vector<128x128xf32>
    %cst_13 = arith.constant dense<0.000000e+00> : vector<128xf32>
    %29 = vector.multi_reduction <add>, %28, %cst_13 [0] : vector<128x128xf32> to vector<128xf32>
    %30 = vector.shape_cast %29 : vector<128xf32> to vector<1x128xf32>
    %31 = arith.mulf %27, %27 : vector<128x128xf32>
    %cst_14 = arith.constant dense<0.000000e+00> : vector<128xf32>
    %32 = vector.multi_reduction <add>, %31, %cst_14 [0] : vector<128x128xf32> to vector<128xf32>
    %33 = vector.shape_cast %32 : vector<128xf32> to vector<1x128xf32>
    %cst_15 = arith.constant 1.000000e-16 : f32
    %34 = vector.broadcast %cst_15 : f32 to vector<1x128xf32>
    %35 = arith.maximumf %33, %34 : vector<1x128xf32>
    %36 = math.rsqrt %35 : vector<1x128xf32>
    %37 = arith.mulf %30, %36 : vector<1x128xf32>
    %c0_16 = arith.constant 0 : index
    %c0_17 = arith.constant 0 : index
    %38 = vector.load %arg4[%c0_16, %c0_17] : memref<1x128xf32, #tpu.memory_space<vmem>>, vector<1x128xf32>
    tpu.vector_store %arg4[%c0_16, %c0_17], %37 {strides = array<i32>} : memref<1x128xf32, #tpu.memory_space<vmem>>, vector<1x128xf32>,
    return
  }
  func.func @transform_0(%arg0: i32) -> (i32, i32) {
    %c0_i32 = arith.constant 0 : i32
    %c0_i32_0 = arith.constant 0 : i32
    return %c0_i32, %arg0 : i32, i32
  }
  func.func @transform_1(%arg0: i32) -> (i32, i32) {
    %c0_i32 = arith.constant 0 : i32
    %c0_i32_0 = arith.constant 0 : i32
    return %c0_i32, %arg0 : i32, i32
  }
  func.func @transform_2(%arg0: i32) -> (i32, i32, i32) {
    %c0_i32 = arith.constant 0 : i32
    %c0_i32_0 = arith.constant 0 : i32
    %c0_i32_1 = arith.constant 0 : i32
    %c0_i32_2 = arith.constant 0 : i32
    return %c0_i32, %c0_i32_0, %c0_i32_1 : i32, i32, i32
  }
  func.func @transform_3(%arg0: i32) -> (i32, i32) {
    %c0_i32 = arith.constant 0 : i32
    %c0_i32_0 = arith.constant 0 : i32
    return %c0_i32, %arg0 : i32, i32
  }
}

</mosaic_0001>

<bundles_post_ra>
// kernel: tpu_custom_call.1
= control target key start
LH: loop header
LB: loop body
LE: loop exit
PB: predicated region body
PF: predicated region fallthrough
CT: control target
= control target key end

     0   :  { %s1814_s0 = inlined_call_operand.hbm [shape: bf16[128,256], index: 0, kind: input, shape index: {}]   ;;  %s1815_s1 = inlined_call_operand.hbm [shape: bf16[128,256], index: 1, kind: input, shape index: {}]   ;;  %s1816_s2 = inlined_call_operand.hbm [shape: bf16[2,128,128], index: 2, kind: input, shape index: {}]   ;;  %s1817_s3 = inlined_call_operand.hbm [shape: f32[1,256], index: 3, kind: output, shape index: {}]  }
   0x1   :  { %1822 = sst [smem:[#allocation13_spill]] %s1814_s0 }
   0x2   :  { %8 = vsyncpa [#allocation3], 0 }
   0x3   :  { %10 = vsyncpa [#allocation3 + $0x1], 0 }
   0x4   :  { %11 = vsyncpa [#allocation6], 0 }
   0x5   :  { %13 = vsyncpa [#allocation6 + $0x1], 0 }
   0x6   :  { %14 = vsyncpa [#allocation4], 0 }
   0x7   :  { %16 = vsyncpa [#allocation4 + $0x1], 0  ;;  %s1426_s12 = smov 0   ;;  %s1428_s13 = smov 0  }
   0x8   :  { %s1430_s14 = smov 0   ;;  %s1432_s15 = smov 0  }
   0x9 LB: > { %s1447_s16 = sadd.s32 4294967295, %s1397_s15   ;;  %s943_s17 = sadd.s32 4294967294, %s1397_s15   ;;  %s1397_s15 = sphi %s1432_s15, %s1843_s15   ;;  %s1393_s14 = sphi %s1430_s14, %s1842_s14   ;;  %s1389_s13 = sphi %s1428_s13, %s1841_s13   ;;  %s1385_s12 = sphi %s1426_s12, %s1840_s12  }
   0xa   : > { %s1451_s18 = sadd.s32 1, %s1397_s15   ;;  %s29_s19 = sadd.s32 1, %s1393_s14 }
   0xb   : > { %s26_s20 = ssub.s32 %s1397_s15, %s1451_s18  ;;  %p36_p0 = scmp.ne.s32.totalorder %s1393_s14, %s1389_s13 }
   0xc   : > { %p27_p1 = scmp.eq.s32.totalorder %s26_s20, 0  ;;  %p37_p2 = scmp.eq.s32.totalorder %s1397_s15, 0 }
   0xd   : > { %p42_p3 = scmp.ne.s32.totalorder %s1389_s13, %s1385_s12  ;;  %p1818_p4 = scmp.eq.s32.totalorder %s1447_s16, 0 }
   0xe   : > { %s1463_s21 = scalar_select %p27_p1, %s1393_s14, %s29_s19  }
   0xf   : > { %p1465_p5 = por %p37_p2, %p36_p0  ;;  %p1471_p6 = por %p1818_p4, %p42_p3 }
  0x10   : > { %p113_p7 = scmp.eq.s32.totalorder %s1447_s16, 1  ;;  %p119_p8 = scmp.eq.s32.totalorder %s943_s17, 1 }
  0x11   : > { %s1823_s22 = scalar_select %p1465_p5, 1, 0 }
  0x12   : > { %s1824_s23 = scalar_select %p1471_p6, 1, 0 }
  0x13   : > { %p944_p9 = scmp.ge.s32.totalorder %s1397_s15, 1  ;;  %p126_p10 = scmp.lt.s32.totalorder %s1397_s15, 3 }
  0x14   : > { %p1478_p11 = por %p113_p7, %p36_p0  ;;  %p1482_p12 = por %p119_p8, %p42_p3 }
  0x15   : > { %p1486_p13 = pnand %p944_p9, %p126_p10  ;;  %s1399_s27 = smov [#allocation7]  }
  0x16   : > { %s1825_s24 = scalar_select %p1478_p11, 1, 0 }
  0x17   : > { %s1826_s25 = scalar_select %p1482_p12, 1, 0 }
  0x18   : > { %s1827_s26 = scalar_select %p1486_p13, 1, 0 }
  0x19   : > { %p1158_p1 = pneg %p1486_p13  ;;  %s138_s28 = sshll.u32 %s1399_s27, 4  ;;  %s139_s28 = int_to_ptr.vmem [resolvable:$true] %s138_s28 }
  0x1a   : > { %s152_s30 = sand.u32 1, %s1393_s14   ;;  %s1235_s6 = scalar_lea.hbm %s1816_s2, 2048 }
  0x1b   : > { %p1494_p2 = pnand %p1158_p1, %p1818_p4  ;;  %p1236_p7 = scmp.ne.s32.totalorder %s1816_s2, %s1235_s6 }
  0x1c   : > { %p1242_p1 = scmp.lt.u32.totalorder %s1235_s6, %s1816_s2 }
  0x1d   : > { %p1237_p8 = pneg %p1494_p2 }
  0x1f   : > { %p1238_p9 = pnand %p1237_p8, %p1236_p7 }
  0x21   : > { %p1239_p10 = pneg %p1238_p9 }
  0x23   : > { %p1244_p4 = pnand %p1242_p1, %p1239_p10 }
  0x25   : > { %1247 = shalt.err (!%p1244_p4)
}
  0x26   : > { %s1248_s11 = scalar_lea.vmem %s139_s28, 2048  ;;  %p1256_p11 = scmp.lt.s32.totalorder %s139_s28, %s139_s28 }
  0x27   : > { %p1249_p0 = scmp.ne.s32.totalorder %s139_s28, %s1248_s11  ;;  %p1257_p6 = scmp.lt.s32.totalorder %s1248_s11, %s1248_s11 }
  0x29   : > { %p1251_p3 = pnand %p1249_p0, %p1237_p8  ;;  %p1258_p13 = por %p1257_p6, %p1256_p11 }
  0x2b   : > { %p1252_p12 = pneg %p1251_p3 }
  0x2d   : > { %p1259_p5 = pnand %p1258_p13, %p1252_p12 }
  0x2f   : > { %1262 = shalt.err (!%p1259_p5)
}
  0x30   : > { %s1400_s17 = smov 64   ;;  %s1401_s19 = smov 4  }
  0x31   : > { %1161 = dma.hbm_to_vmem [thread:$0]  (!%p1494_p2), %s1816_s2, 2048, %s139_s28, [#allocation6], %s1400_s17, %s1400_s17, %s1401_s19  }
  0x32   : > { %p1829_p4 = scmp.ne.s32.totalorder %s1823_s22, 0  ;;  %p1830_p0 = scmp.lt.s32.totalorder %s1397_s15, 2 }
  0x33   : > { %s1528_s5 = sshll.u32 %s152_s30, 6  ;;  %s948_s6 = sshll.u32 %s1397_s15, 6 }
  0x34   : > { %p1524_p6 = pnand %p1830_p0, %p1829_p4  ;;  %s1832_s0 = sld [smem:[#allocation13_spill]] }
  0x35   : > { %s156_s22 = scalar_lea.vmem [#allocation2], %s1528_s5  ;;  %s1541_s9 = scalar_lea.sflag [#allocation3], %s152_s30 }
  0x36   : > { %s162_s28 = sshll.u32 %s156_s22, 4  ;;  %p1265_p11 = pneg %p1524_p6  ;;  %s1539_s28 = int_to_ptr.vmem [resolvable:$true] %s162_s28 }
  0x3a   : > { %s1536_s8 = scalar_lea.hbm %s1832_s0, %s948_s6  ;;  %s1268_s27 = scalar_lea.hbm %s1832_s0, 2048 }
  0x3b   : > { %s1263_s10 = scalar_lea.hbm %s1536_s8, 1024  ;;  %p1269_p2 = scmp.lt.u32.totalorder %s1536_s8, %s1832_s0 }
  0x3c   : > { %p1264_p5 = scmp.ne.s32.totalorder %s1536_s8, %s1263_s10  ;;  %p1270_p3 = scmp.lt.u32.totalorder %s1268_s27, %s1263_s10 }
  0x3d   : > { %p1272_p8 = scmp.lt.u32.totalorder %s1263_s10, %s1536_s8 }
  0x3e   : > { %p1266_p12 = pnand %p1265_p11, %p1264_p5  ;;  %p1271_p7 = por %p1270_p3, %p1269_p2 }
  0x40   : > { %p1267_p13 = pneg %p1266_p12  ;;  %p1273_p9 = por %p1272_p8, %p1271_p7 }
  0x42   : > { %p1274_p10 = pnand %p1273_p9, %p1267_p13 }
  0x44   : > { %1277 = shalt.err (!%p1274_p10)
}
  0x45   : > { %s1278_s30 = scalar_lea.vmem %s1539_s28, 1024  ;;  %s1402_s22 = smov [#allocation2]  }
  0x46   : > { %p1279_p1 = scmp.ne.s32.totalorder %s1539_s28, %s1278_s30  ;;  %s1283_s11 = sshll.u32 %s1402_s22, 4  ;;  %s1284_s11 = int_to_ptr.vmem [resolvable:$false] %s1283_s11 }
  0x47   : > { %s1285_s20 = scalar_lea.vmem %s1284_s11, 2048  ;;  %p1286_p5 = scmp.lt.s32.totalorder %s1539_s28, %s1284_s11 }
  0x48   : > { %p1281_p4 = pnand %p1279_p1, %p1265_p11  ;;  %p1287_p12 = scmp.lt.s32.totalorder %s1285_s20, %s1278_s30 }
  0x4a   : > { %p1282_p0 = pneg %p1281_p4  ;;  %p1288_p2 = por %p1287_p12, %p1286_p5 }
  0x4c   : > { %p1289_p3 = pnand %p1288_p2, %p1282_p0 }
  0x4e   : > { %1292 = shalt.err (!%p1289_p3)
}
  0x4f   : > { %s1403_s10 = smov 128   ;;  %s1577_s7 = scalar_lea.hbm %s1815_s1, %s948_s6 }
  0x50   : > { %1165 = dma.hbm_to_vmem [thread:$0]  (!%p1524_p6), %s1536_s8, 1024, %s1539_s28, %s1541_s9, %s1403_s10, %s1400_s17, %s1401_s19  }
  0x51   : > { %s176_s30 = scalar_lea.vmem [#allocation5], %s1528_s5  ;;  %s172_s11 = sand.u32 1, %s1397_s15  }
  0x52   : > { %s182_s22 = sshll.u32 %s176_s30, 4  ;;  %s1583_s20 = scalar_lea.sflag [#allocation6], %s172_s11  ;;  %s1580_s22 = int_to_ptr.vmem [resolvable:$true] %s182_s22 }
  0x53   : > { %s1293_s0 = scalar_lea.hbm %s1577_s7, 1024  ;;  %s1298_s28 = scalar_lea.hbm %s1815_s1, 2048 }
  0x54   : > { %p1294_p13 = scmp.ne.s32.totalorder %s1577_s7, %s1293_s0  ;;  %p1299_p9 = scmp.lt.u32.totalorder %s1577_s7, %s1815_s1 }
  0x55   : > { %p1300_p10 = scmp.lt.u32.totalorder %s1298_s28, %s1293_s0  ;;  %p1302_p4 = scmp.lt.u32.totalorder %s1293_s0, %s1577_s7 }
  0x56   : > { %p1296_p7 = pnand %p1294_p13, %p1265_p11 }
  0x57   : > { %p1301_p1 = por %p1300_p10, %p1299_p9 }
  0x58   : > { %p1297_p8 = pneg %p1296_p7 }
  0x59   : > { %p1303_p0 = por %p1302_p4, %p1301_p1 }
  0x5b   : > { %p1304_p5 = pnand %p1303_p0, %p1297_p8 }
  0x5d   : > { %1307 = shalt.err (!%p1304_p5)
}
  0x5e   : > { %s1308_s5 = scalar_lea.vmem %s1580_s22, 1024  ;;  %s1404_s29 = smov [#allocation5]  }
  0x5f   : > { %p1309_p12 = scmp.ne.s32.totalorder %s1580_s22, %s1308_s5  ;;  %s1313_s30 = sshll.u32 %s1404_s29, 4  ;;  %s1314_s30 = int_to_ptr.vmem [resolvable:$false] %s1313_s30 }
  0x60   : > { %s1315_s11 = scalar_lea.vmem %s1314_s30, 2048  ;;  %p1316_p13 = scmp.lt.s32.totalorder %s1580_s22, %s1314_s30 }
  0x61   : > { %p1311_p2 = pnand %p1309_p12, %p1265_p11  ;;  %p1317_p7 = scmp.lt.s32.totalorder %s1315_s11, %s1308_s5 }
  0x63   : > { %p1312_p3 = pneg %p1311_p2  ;;  %p1318_p9 = por %p1317_p7, %p1316_p13 }
  0x65   : > { %p1319_p10 = pnand %p1318_p9, %p1312_p3 }
  0x67   : > { %1322 = shalt.err (!%p1319_p10)
}
  0x68   : > { %1168 = dma.hbm_to_vmem [thread:$0]  (!%p1524_p6), %s1577_s7, 1024, %s1580_s22, %s1583_s20, %s1403_s10, %s1400_s17, %s1401_s19  }
  0x69   : > { %p1833_p11 = scmp.ne.s32.totalorder %s1827_s26, 0 }
  0x6a   : > { %s1615_s0 = sand.u32 (!%p1833_p11), 1, %s1389_s13   ;;  %p1834_p8 = scmp.ne.s32.totalorder (!%p1833_p11), %s1824_s23, 0 }
  0x6b   : > { %194 = sbr.rel (%p1833_p11) target bundleno = 754 (0x2f2), region = 32  ;;  %s952_s8 = sshll.u32 (!%p1833_p11), %s1615_s0, 6 }
  0x6c   : > { %s197_s6 = scalar_lea.sflag (!%p1833_p11), [#allocation3], %s1615_s0  ;;  %s1619_s28 = scalar_lea.vmem (!%p1833_p11), [#allocation2], %s952_s8 }
  0x72   : > { %1368 = dma.done.wait (%p1834_p8), %s197_s6, 1024  }
  0x73   : > { %1370 = vsyncadd (%p1834_p8), %s197_s6, 4294966272  ;;  %s205_s17 = sand.u32 1, %s1447_s16   ;;  %s1626_s19 = scalar_lea.vmem [#allocation5], %s952_s8 }
  0x74   : > { %s206_s26 = scalar_lea.sflag [#allocation6], %s205_s17 }
  0x75   : > { %1372 = dma.done.wait (%p1834_p8), %s206_s26, 1024  }
  0x76   : > { %1374 = vsyncadd (%p1834_p8), %s206_s26, 4294966272  ;;  %p1835_p6 = scmp.eq.s32.totalorder %s1447_s16, 0 }
  0x78   : > { %1376 = dma.done.wait (%p1835_p6), [#allocation6], 2048   ;;  %p1836_p1 = pmov %p1835_p6 }
  0x79   : > { %v975_v0 = vld [vmem:[%s1619_s28] sm:$0xff]   ;;  %v1038_v1 = vld [vmem:[%s1619_s28 + $0x8] sm:$0xff]   ;;  %v1039_v6 = vld [vmem:[%s1619_s28 + $0x10] sm:$0xff]   ;;  %s971_s23 = sshll.u32 %s1447_s16, 4  ;;  %s239_s4 = scalar_lea.vmem [#allocation8], %s1615_s0 }
  0x7a   : > { %1378 = vsyncadd (%p1836_p1), [#allocation6], 4294965248  ;;  %v1638_v2 = vunpack.c.l.bf16 %v975_v0  ;;  %v1640_v3 = vunpack.c.h.bf16 %v975_v0  ;;  %v1642_v4 = vunpack.c.l.bf16 %v1038_v1  ;;  %v1213_v5 = vld [vmem:[#allocation7] sm:$0xff]   ;;  %v981_v7 = vunpack.c.h.bf16 %v1038_v1  ;;  %v1040_v12 = vld [vmem:[%s1619_s28 + $0x18] sm:$0xff]   ;;  %s845_s10 = sshll.u32 %s239_s4, 4  ;;  %s1770_s20 = scalar_lea.hbm %s1817_s3, %s971_s23  ;;  %s1772_s10 = int_to_ptr.vmem [resolvable:$true] %s845_s10 }
  0x7b   : > { %1100 = vmatprep.mubr.bf16.mxu0 %v1213_v5  ;;  %v984_v10 = vunpack.c.l.bf16 %v1039_v6  ;;  %v985_v13 = vunpack.c.h.bf16 %v1039_v6  ;;  %v1041_v16 = vld [vmem:[%s1619_s28 + $0x20] sm:$0xff]   ;;  %v988_v17 = vunpack.c.l.bf16 %v1040_v12  ;;  %v989_v20 = vunpack.c.h.bf16 %v1040_v12  ;;  %v1042_v26 = vld [vmem:[%s1619_s28 + $0x28] sm:$0xff]   ;;  %v1043_v33 = vld [vmem:[%s1619_s28 + $0x30] sm:$0xff]   ;;  %s833_s9 = scalar_lea.sflag [#allocation4], %s1615_s0  ;;  %s1323_s27 = scalar_lea.vmem %s1772_s10, 16 }
  0x7c   : > { %v273_v8 = vmul.f32 %v1638_v2, %v1638_v2  ;;  %v274_v9 = vmul.f32 %v1640_v3, %v1640_v3  ;;  %v275_v11 = vmul.f32 %v1642_v4, %v1642_v4  ;;  %v276_v14 = vmul.f32 %v981_v7, %v981_v7  ;;  %v1044_v40 = vld [vmem:[%s1619_s28 + $0x38] sm:$0xff]   ;;  %p1324_p4 = scmp.ne.s32.totalorder %s1772_s10, %s1323_s27  ;;  %p1837_p0 = scmp.ne.s32.totalorder %s1825_s24, 0 }
  0x7d   : > { %v277_v18 = vmul.f32 %v984_v10, %v984_v10  ;;  %v278_v21 = vmul.f32 %v985_v13, %v985_v13  ;;  %v992_v23 = vunpack.c.l.bf16 %v1041_v16  ;;  %v279_v24 = vmul.f32 %v988_v17, %v988_v17  ;;  %s1405_s16 = smov [#allocation8]  }
  0x7e   : > { %v289_v15 = vadd.f32 %v274_v9, %v273_v8  ;;  %v993_v27 = vunpack.c.h.bf16 %v1041_v16  ;;  %v280_v28 = vmul.f32 %v989_v20, %v989_v20  ;;  %v996_v30 = vunpack.c.l.bf16 %v1042_v26  ;;  %p1325_p5 = pnand %p1324_p4, %p1837_p0  ;;  %s1327_s5 = sshll.u32 %s1405_s16, 4  ;;  %s1328_s5 = int_to_ptr.vmem [resolvable:$false] %s1327_s5 }
  0x7f   : > { %v281_v31 = vmul.f32 %v992_v23, %v992_v23  ;;  %v997_v34 = vunpack.c.h.bf16 %v1042_v26  ;;  %v1000_v37 = vunpack.c.l.bf16 %v1043_v33  ;;  %v1001_v41 = vunpack.c.h.bf16 %v1043_v33  ;;  %v1216_v26 = vld [vmem:[#allocation7 + $0x18] sm:$0xff]   ;;  %s1329_s29 = scalar_lea.vmem %s1328_s5, 32  ;;  %p1330_p2 = scmp.lt.s32.totalorder %s1772_s10, %s1328_s5 }
  0x80   : > { %v290_v19 = vadd.f32 %v289_v15, %v275_v11  ;;  %v282_v35 = vmul.f32 %v993_v27, %v993_v27  ;;  %v283_v38 = vmul.f32 %v996_v30, %v996_v30  ;;  %v1004_v44 = vunpack.c.l.bf16 %v1044_v40  ;;  %p1326_p12 = pneg %p1325_p5  ;;  %p1331_p3 = scmp.lt.s32.totalorder %s1329_s29, %s1323_s27 }
  0x81   : > { %v284_v42 = vmul.f32 %v997_v34, %v997_v34  ;;  %v285_v45 = vmul.f32 %v1000_v37, %v1000_v37  ;;  %v1005_v47 = vunpack.c.h.bf16 %v1044_v40  ;;  %v286_v48 = vmul.f32 %v1001_v41, %v1001_v41 }
  0x82   : > { %v291_v22 = vadd.f32 %v290_v19, %v276_v14  ;;  %v287_v50 = vmul.f32 %v1004_v44, %v1004_v44  ;;  %p1332_p13 = por %p1331_p3, %p1330_p2 }
  0x83   : > { %v288_v52 = vmul.f32 %v1005_v47, %v1005_v47 }
  0x84   : > { %v292_v25 = vadd.f32 %v291_v22, %v277_v18  ;;  %p1333_p7 = pnand %p1332_p13, %p1326_p12 }
  0x86   : > { %v293_v29 = vadd.f32 %v292_v25, %v278_v21  ;;  %v1215_v25 = vld [vmem:[#allocation7 + $0x10] sm:$0xff]  }
  0x88   : > { %v294_v32 = vadd.f32 %v293_v29, %v279_v24  ;;  %v1219_v29 = vld [vmem:[#allocation7 + $0x30] sm:$0xff]  }
  0x8a   : > { %v295_v36 = vadd.f32 %v294_v32, %v280_v28  ;;  %v1218_v28 = vld [vmem:[#allocation7 + $0x28] sm:$0xff]  }
  0x8c   : > { %v296_v39 = vadd.f32 %v295_v36, %v281_v31  ;;  %v1221_v31 = vld [vmem:[#allocation7 + $0x40] sm:$0xff]  }
  0x8d   : > { %1132 = vmatprep.mubr.bf16.mxu1 %v1221_v31 }
  0x8e   : > { %v297_v43 = vadd.f32 %v296_v39, %v282_v35 }
  0x90   : > { %v298_v46 = vadd.f32 %v297_v43, %v283_v38 }
  0x92   : > { %v299_v49 = vadd.f32 %v298_v46, %v284_v42 }
  0x94   : > { %v300_v51 = vadd.f32 %v299_v49, %v285_v45 }
  0x96   : > { %v301_v53 = vadd.f32 %v300_v51, %v286_v48 }
  0x98   : > { %v302_v54 = vadd.f32 %v301_v53, %v287_v50 }
  0x9a   : > { %v303_v55 = vadd.f32 %v302_v54, %v288_v52 }
  0x9c   : > { %v304_v56 = vrot.slane %v303_v55, 4 }
  0x9e   : > { %v305_v57 = vadd.f32 %v304_v56, %v303_v55  ;;  %v1222_v56 = vld [vmem:[#allocation7 + $0x48] sm:$0xff]  }
  0xa0   : > { %v306_v58 = vrot.slane %v305_v57, 2 }
  0xa2   : > { %v307_v59 = vadd.f32 %v306_v58, %v305_v57  ;;  %v1223_v57 = vld [vmem:[#allocation7 + $0x50] sm:$0xff]   ;;  %v1224_v58 = vld [vmem:[#allocation7 + $0x58] sm:$0xff]  }
  0xa4   : > { %v308_v60 = vrot.slane %v307_v59, 1 }
  0xa6   : > { %v309_v61 = vadd.f32 %v308_v60, %v307_v59  ;;  %v1225_v59 = vld [vmem:[#allocation7 + $0x60] sm:$0xff]   ;;  %v1226_v60 = vld [vmem:[#allocation7 + $0x68] sm:$0xff]  }
  0xa8   : > { %v310_v62 = vmax.f32 %v309_v61, 1e-30  ;;  %v1227_v61 = vld [vmem:[#allocation7 + $0x70] sm:$0xff]  }
  0xaa   : > { %1229 = vrsqrt.f32 %v310_v62  ;;  %v1228_v62 = vld [vmem:[#allocation7 + $0x78] sm:$0xff]  }
  0xb4   : > { %v1230_v63 = vpop.eup %1229 }
  0xb5   : > { %v312_v0 = vmul.f32 %v1230_v63, %v1638_v2  ;;  %v313_v1 = vmul.f32 %v1230_v63, %v1640_v3  ;;  %v314_v5 = vmul.f32 %v1230_v63, %v1642_v4  ;;  %v315_v6 = vmul.f32 %v1230_v63, %v981_v7 }
  0xb6   : > { %v316_v11 = vmul.f32 %v1230_v63, %v984_v10  ;;  %v317_v12 = vmul.f32 %v1230_v63, %v985_v13  ;;  %v318_v15 = vmul.f32 %v1230_v63, %v988_v17  ;;  %v319_v16 = vmul.f32 %v1230_v63, %v989_v20 }
  0xb7   : > { %v431_v8 = vpack.c.bf16 %v313_v1, %v312_v0  ;;  %v432_v9 = vpack.c.bf16 %v315_v6, %v314_v5  ;;  %v320_v19 = vmul.f32 %v1230_v63, %v992_v23  ;;  %v321_v2 = vmul.f32 %v1230_v63, %v993_v27  ;;  %v1214_v23 = vld [vmem:[#allocation7 + $0x8] sm:$0xff]   ;;  %v1217_v27 = vld [vmem:[#allocation7 + $0x20] sm:$0xff]  }
  0xb8   : > { %v433_v14 = vpack.c.bf16 %v317_v12, %v316_v11  ;;  %v434_v18 = vpack.c.bf16 %v319_v16, %v318_v15  ;;  %v322_v4 = vmul.f32 %v1230_v63, %v996_v30  ;;  %v323_v7 = vmul.f32 %v1230_v63, %v997_v34  ;;  %v1220_v30 = vld [vmem:[#allocation7 + $0x38] sm:$0xff]   ;;  %v1045_v5 = vld [vmem:[%s1626_s19 + $0x8] sm:$0xff]   ;;  %v1046_v15 = vld [vmem:[%s1626_s19 + $0x10] sm:$0xff]  }
  0xb9   : > { %1084 = vmatprep.subr.bf16.mxu0 %v431_v8  ;;  %v435_v3 = vpack.c.bf16 %v321_v2, %v320_v19  ;;  %v324_v13 = vmul.f32 %v1230_v63, %v1000_v37  ;;  %v325_v21 = vmul.f32 %v1230_v63, %v1001_v41  ;;  %v326_v17 = vmul.f32 %v1230_v63, %v1004_v44 }
  0xba   : > { %1085 = vmatpush3.bf16.msra.mxu0 %v431_v8  ;;  %v436_v10 = vpack.c.bf16 %v323_v7, %v322_v4  ;;  %v327_v20 = vmul.f32 %v1230_v63, %v1005_v47  ;;  %v1007_v63 = vld [vmem:[%s1626_s19] sm:$0xff]   ;;  %v1665_v6 = vunpack.c.l.bf16 %v1045_v5  ;;  %v1671_v11 = vunpack.c.h.bf16 %v1045_v5  ;;  %v1047_v7 = vld [vmem:[%s1626_s19 + $0x18] sm:$0xff]  }
  0xbb   : > { %1086 = vmatprep.subr.bf16.mxu0 %v432_v9  ;;  %v437_v22 = vpack.c.bf16 %v325_v21, %v324_v13  ;;  %v1660_v0 = vunpack.c.l.bf16 %v1007_v63  ;;  %v1662_v1 = vunpack.c.h.bf16 %v1007_v63  ;;  %v1676_v16 = vunpack.c.l.bf16 %v1046_v15 }
  0xbc   : > { %v438_v24 = vpack.c.bf16 %v327_v20, %v326_v17  ;;  %v362_v12 = vmul.f32 %v1665_v6, %v1665_v6  ;;  %v1680_v2 = vunpack.c.h.bf16 %v1046_v15 }
  0xbd   : > { %v360_v8 = vmul.f32 %v1660_v0, %v1660_v0 }
  0xbe   : > { %1087 = vmatpush3.bf16.msra.mxu0 %v432_v9  ;;  %v361_v9 = vmul.f32 %v1662_v1, %v1662_v1  ;;  %v365_v13 = vmul.f32 %v1680_v2, %v1680_v2 }
  0xbf   : > { %1088 = vmatprep.subr.bf16.mxu0 %v433_v14 }
  0xc2   : > { %1089 = vmatpush3.bf16.msra.mxu0 %v433_v14  ;;  %v376_v14 = vadd.f32 %v361_v9, %v360_v8 }
  0xc3   : > { %1090 = vmatprep.subr.bf16.mxu0 %v434_v18 }
  0xc4   : > { %v377_v19 = vadd.f32 %v376_v14, %v362_v12 }
  0xc6   : > { %1091 = vmatpush3.bf16.msra.mxu0 %v434_v18  ;;  %v363_v18 = vmul.f32 %v1671_v11, %v1671_v11 }
  0xc7   : > { %1092 = vmatprep.subr.bf16.mxu0 %v435_v3 }
  0xc8   : > { %v378_v4 = vadd.f32 %v377_v19, %v363_v18 }
  0xca   : > { %1093 = vmatpush3.bf16.msra.mxu0 %v435_v3  ;;  %v364_v3 = vmul.f32 %v1676_v16, %v1676_v16 }
  0xcb   : > { %1094 = vmatprep.subr.bf16.mxu0 %v436_v10 }
  0xcc   : > { %v379_v21 = vadd.f32 %v378_v4, %v364_v3 }
  0xce   : > { %1095 = vmatpush3.bf16.msra.mxu0 %v436_v10  ;;  %v1685_v10 = vunpack.c.l.bf16 %v1047_v7  ;;  %v380_v20 = vadd.f32 %v379_v21, %v365_v13 }
  0xcf   : > { %1096 = vmatprep.subr.bf16.mxu0 %v437_v22 }
  0xd0   : > { %v366_v17 = vmul.f32 %v1685_v10, %v1685_v10 }
  0xd2   : > { %1097 = vmatpush3.bf16.msra.mxu0 %v437_v22  ;;  %v1689_v22 = vunpack.c.h.bf16 %v1047_v7 }
  0xd3   : > { %1098 = vmatprep.subr.bf16.mxu0 %v438_v24 }
  0xd6   : > { %1099 = vmatpush3.bf16.msra.mxu0 %v438_v24  ;;  %v1048_v24 = vld [vmem:[%s1626_s19 + $0x20] sm:$0xff]  }
  0xd9   : > { %1101 = vmatmul.mubr.bf16.vlgmr.msra.gmra.mrb[0].mxu0 %v1214_v23  ;;  %v1694_v23 = vunpack.c.l.bf16 %v1048_v24 }
  0xda   : > { %1104 = vmatprep.mubr.bf16.mxu0 %v1215_v25  ;;  %v367_v25 = vmul.f32 %v1689_v22, %v1689_v22 }
  0xe1   : > { %1105 = vmatmul.mubr.bf16.gmra.mrb[4].mxu0 %v1216_v26  ;;  %v381_v26 = vadd.f32 %v380_v20, %v366_v17 }
  0xe2   : > { %1108 = vmatprep.mubr.bf16.mxu0 %v1217_v27  ;;  %v1698_v27 = vunpack.c.h.bf16 %v1048_v24 }
  0xe9   : > { %1109 = vmatmul.mubr.bf16.gmra.mrb[8].mxu0 %v1218_v28  ;;  %v368_v28 = vmul.f32 %v1694_v23, %v1694_v23 }
  0xea   : > { %1112 = vmatprep.mubr.bf16.mxu0 %v1219_v29  ;;  %v382_v29 = vadd.f32 %v381_v26, %v367_v25 }
  0xf1   : > { %1113 = vmatmul.mubr.bf16.gmra.mrb[12].mxu0 %v1220_v30  ;;  %v1049_v30 = vld [vmem:[%s1626_s19 + $0x28] sm:$0xff]  }
  0xf2   : > { %v1703_v31 = vunpack.c.l.bf16 %v1049_v30 }
 0x1ac   : > { %v1102_v32 = vpop.f32.mrb[0].mxu0 }
 0x1ad   : > { %v521_v33 = vpop.f32.mrb[1].mxu0 }
 0x1ae   : > { %v1103_v34 = vpop.f32.mrb[2].mxu0 }
 0x1af   : > { %v602_v35 = vpack.c.bf16 %v1103_v34, %v1102_v32  ;;  %v524_v36 = vpop.f32.mrb[3].mxu0  ;;  %v369_v32 = vmul.f32 %v1698_v27, %v1698_v27  ;;  %v1707_v34 = vunpack.c.h.bf16 %v1049_v30 }
 0x1b0   : > { %v601_v37 = vpack.c.bf16 %v524_v36, %v521_v33  ;;  %v383_v33 = vadd.f32 %v382_v29, %v368_v28 }
 0x1b2   : > { %1116 = vmatprep.subr.bf16.mxu1 %v601_v37  ;;  %v384_v36 = vadd.f32 %v383_v33, %v369_v32 }
 0x1b3   : > { %1117 = vmatpush3.bf16.msra.mxu1 %v601_v37  ;;  %v1050_v37 = vld [vmem:[%s1626_s19 + $0x30] sm:$0xff]  }
 0x1b4   : > { %v1106_v38 = vpop.f32.mrb[4].mxu0  ;;  %1118 = vmatprep.subr.bf16.mxu1 %v602_v35 }
 0x1b5   : > { %v537_v39 = vpop.f32.mrb[5].mxu0 }
 0x1b6   : > { %v1107_v40 = vpop.f32.mrb[6].mxu0 }
 0x1b7   : > { %v604_v41 = vpack.c.bf16 %v1107_v40, %v1106_v38  ;;  %v540_v42 = vpop.f32.mrb[7].mxu0  ;;  %1119 = vmatpush3.bf16.msra.mxu1 %v602_v35  ;;  %v370_v35 = vmul.f32 %v1703_v31, %v1703_v31  ;;  %v1712_v38 = vunpack.c.l.bf16 %v1050_v37 }
 0x1b8   : > { %v603_v43 = vpack.c.bf16 %v540_v42, %v537_v39  ;;  %v371_v39 = vmul.f32 %v1707_v34, %v1707_v34 }
 0x1b9   : > { %v385_v40 = vadd.f32 %v384_v36, %v370_v35  ;;  %v372_v42 = vmul.f32 %v1712_v38, %v1712_v38 }
 0x1ba   : > { %1120 = vmatprep.subr.bf16.mxu1 %v603_v43 }
 0x1bb   : > { %1121 = vmatpush3.bf16.msra.mxu1 %v603_v43  ;;  %v386_v43 = vadd.f32 %v385_v40, %v371_v39 }
 0x1bc   : > { %v1110_v44 = vpop.f32.mrb[8].mxu0  ;;  %1122 = vmatprep.subr.bf16.mxu1 %v604_v41 }
 0x1bd   : > { %v553_v45 = vpop.f32.mrb[9].mxu0 }
 0x1be   : > { %v1111_v46 = vpop.f32.mrb[10].mxu0 }
 0x1bf   : > { %v606_v47 = vpack.c.bf16 %v1111_v46, %v1110_v44  ;;  %v556_v48 = vpop.f32.mrb[11].mxu0  ;;  %1123 = vmatpush3.bf16.msra.mxu1 %v604_v41  ;;  %v1716_v41 = vunpack.c.h.bf16 %v1050_v37  ;;  %v1051_v44 = vld [vmem:[%s1626_s19 + $0x38] sm:$0xff]  }
 0x1c0   : > { %v605_v49 = vpack.c.bf16 %v556_v48, %v553_v45  ;;  %v1721_v45 = vunpack.c.l.bf16 %v1051_v44  ;;  %v1725_v48 = vunpack.c.h.bf16 %v1051_v44 }
 0x1c1   : > { %v373_v46 = vmul.f32 %v1716_v41, %v1716_v41 }
 0x1c2   : > { %1124 = vmatprep.subr.bf16.mxu1 %v605_v49 }
 0x1c3   : > { %1125 = vmatpush3.bf16.msra.mxu1 %v605_v49  ;;  %v374_v49 = vmul.f32 %v1721_v45, %v1721_v45 }
 0x1c4   : > { %v1114_v50 = vpop.f32.mrb[12].mxu0  ;;  %1126 = vmatprep.subr.bf16.mxu1 %v606_v47 }
 0x1c5   : > { %v569_v51 = vpop.f32.mrb[13].mxu0 }
 0x1c6   : > { %v1115_v52 = vpop.f32.mrb[14].mxu0 }
 0x1c7   : > { %v608_v53 = vpack.c.bf16 %v1115_v52, %v1114_v50  ;;  %v572_v54 = vpop.f32.mrb[15].mxu0  ;;  %1127 = vmatpush3.bf16.msra.mxu1 %v606_v47  ;;  %v387_v47 = vadd.f32 %v386_v43, %v372_v42 }
 0x1c8   : > { %v607_v55 = vpack.c.bf16 %v572_v54, %v569_v51  ;;  %v375_v51 = vmul.f32 %v1725_v48, %v1725_v48 }
 0x1c9   : > { %v388_v50 = vadd.f32 %v387_v47, %v373_v46 }
 0x1ca   : > { %1128 = vmatprep.subr.bf16.mxu1 %v607_v55 }
 0x1cb   : > { %1129 = vmatpush3.bf16.msra.mxu1 %v607_v55  ;;  %v389_v52 = vadd.f32 %v388_v50, %v374_v49 }
 0x1cc   : > { %1130 = vmatprep.subr.bf16.mxu1 %v608_v53 }
 0x1cf   : > { %1131 = vmatpush3.bf16.msra.mxu1 %v608_v53  ;;  %v390_v53 = vadd.f32 %v389_v52, %v375_v51 }
 0x1d1   : > { %v391_v54 = vrot.slane %v390_v53, 4 }
 0x1d2   : > { %1133 = vmatmul.mubr.bf16.vlgmr.msra.gmra.mrb[0].mxu1 %v1222_v56 }
 0x1d3   : > { %1136 = vmatprep.mubr.bf16.mxu1 %v1223_v57  ;;  %v392_v55 = vadd.f32 %v391_v54, %v390_v53 }
 0x1d5   : > { %v393_v56 = vrot.slane %v392_v55, 2 }
 0x1d7   : > { %v394_v57 = vadd.f32 %v393_v56, %v392_v55 }
 0x1da   : > { %1137 = vmatmul.mubr.bf16.gmra.mrb[4].mxu1 %v1224_v58  ;;  %v395_v58 = vrot.slane %v394_v57, 1 }
 0x1db   : > { %1140 = vmatprep.mubr.bf16.mxu1 %v1225_v59 }
 0x1dc   : > { %v396_v59 = vadd.f32 %v395_v58, %v394_v57 }
 0x1e2   : > { %1141 = vmatmul.mubr.bf16.gmra.mrb[8].mxu1 %v1226_v60  ;;  %v397_v60 = vmax.f32 %v396_v59, 1e-30 }
 0x1e3   : > { %1144 = vmatprep.mubr.bf16.mxu1 %v1227_v61 }
 0x1e4   : > { %1231 = vrsqrt.f32 %v397_v60 }
 0x1ea   : > { %1145 = vmatmul.mubr.bf16.gmra.mrb[12].mxu1 %v1228_v62 }
 0x1ee   : > { %v1731_v61 = vpop.eup %1231 }
 0x1ef   : > { %v399_v63 = vmul.f32 %v1731_v61, %v1660_v0  ;;  %v400_v5 = vmul.f32 %v1731_v61, %v1662_v1  ;;  %v401_v9 = vmul.f32 %v1731_v61, %v1665_v6  ;;  %v402_v14 = vmul.f32 %v1731_v61, %v1671_v11 }
 0x1f0   : > { %v403_v7 = vmul.f32 %v1731_v61, %v1676_v16  ;;  %v404_v17 = vmul.f32 %v1731_v61, %v1680_v2  ;;  %v405_v26 = vmul.f32 %v1731_v61, %v1685_v10  ;;  %v406_v35 = vmul.f32 %v1731_v61, %v1689_v22 }
 0x1f1   : > { %v407_v42 = vmul.f32 %v1731_v61, %v1694_v23  ;;  %v408_v47 = vmul.f32 %v1731_v61, %v1698_v27  ;;  %v409_v53 = vmul.f32 %v1731_v61, %v1703_v31  ;;  %v410_v59 = vmul.f32 %v1731_v61, %v1707_v34 }
 0x2a5   : > { %v1134_v62 = vpop.f32.mrb[0].mxu1 }
 0x2a6   : > { %v691_v8 = vpop.f32.mrb[1].mxu1  ;;  %v756_v0 = vmul.f32 %v1134_v62, %v401_v9  ;;  %v793_v13 = vmul.f32 %v1134_v62, %v1134_v62 }
 0x2a7   : > { %v1135_v12 = vpop.f32.mrb[2].mxu1  ;;  %v754_v18 = vmul.f32 %v691_v8, %v399_v63  ;;  %v791_v19 = vmul.f32 %v691_v8, %v691_v8  ;;  %v411_v8 = vmul.f32 %v1731_v61, %v1712_v38 }
 0x2a8   : > { %v694_v15 = vpop.f32.mrb[3].mxu1  ;;  %v757_v6 = vmul.f32 %v1135_v12, %v402_v14  ;;  %v794_v20 = vmul.f32 %v1135_v12, %v1135_v12 }
 0x2a9   : > { %v755_v3 = vmul.f32 %v694_v15, %v400_v5  ;;  %v792_v4 = vmul.f32 %v694_v15, %v694_v15  ;;  %v412_v15 = vmul.f32 %v1731_v61, %v1716_v41 }
 0x2ab   : > { %v770_v21 = vadd.f32 %v755_v3, %v754_v18  ;;  %v807_v1 = vadd.f32 %v792_v4, %v791_v19 }
 0x2ad   : > { %v771_v24 = vadd.f32 %v770_v21, %v756_v0  ;;  %v808_v25 = vadd.f32 %v807_v1, %v793_v13  ;;  %v1138_v11 = vpop.f32.mrb[4].mxu1 }
 0x2ae   : > { %v707_v28 = vpop.f32.mrb[5].mxu1  ;;  %v760_v43 = vmul.f32 %v1138_v11, %v405_v26  ;;  %v797_v44 = vmul.f32 %v1138_v11, %v1138_v11 }
 0x2af   : > { %v758_v29 = vmul.f32 %v707_v28, %v403_v7  ;;  %v772_v30 = vadd.f32 %v771_v24, %v757_v6  ;;  %v795_v32 = vmul.f32 %v707_v28, %v707_v28  ;;  %v809_v16 = vadd.f32 %v808_v25, %v794_v20  ;;  %v1139_v33 = vpop.f32.mrb[6].mxu1 }
 0x2b0   : > { %v710_v36 = vpop.f32.mrb[7].mxu1  ;;  %v761_v49 = vmul.f32 %v1139_v33, %v406_v35  ;;  %v798_v50 = vmul.f32 %v1139_v33, %v1139_v33  ;;  %v413_v7 = vmul.f32 %v1731_v61, %v1721_v45  ;;  %v414_v6 = vmul.f32 %v1731_v61, %v1725_v48 }
 0x2b1   : > { %v773_v37 = vadd.f32 %v772_v30, %v758_v29  ;;  %v810_v2 = vadd.f32 %v809_v16, %v795_v32  ;;  %v759_v39 = vmul.f32 %v710_v36, %v404_v17  ;;  %v796_v40 = vmul.f32 %v710_v36, %v710_v36 }
 0x2b3   : > { %v774_v10 = vadd.f32 %v773_v37, %v759_v39  ;;  %v811_v46 = vadd.f32 %v810_v2, %v796_v40 }
 0x2b5   : > { %v775_v51 = vadd.f32 %v774_v10, %v760_v43  ;;  %v812_v52 = vadd.f32 %v811_v46, %v797_v44  ;;  %v1142_v22 = vpop.f32.mrb[8].mxu1 }
 0x2b6   : > { %v723_v54 = vpop.f32.mrb[9].mxu1  ;;  %v764_v9 = vmul.f32 %v1142_v22, %v409_v53  ;;  %v801_v12 = vmul.f32 %v1142_v22, %v1142_v22 }
 0x2b7   : > { %v762_v55 = vmul.f32 %v723_v54, %v407_v42  ;;  %v776_v56 = vadd.f32 %v775_v51, %v761_v49  ;;  %v799_v57 = vmul.f32 %v723_v54, %v723_v54  ;;  %v813_v23 = vadd.f32 %v812_v52, %v798_v50  ;;  %v1143_v58 = vpop.f32.mrb[10].mxu1 }
 0x2b8   : > { %v726_v60 = vpop.f32.mrb[11].mxu1  ;;  %v765_v18 = vmul.f32 %v1143_v58, %v410_v59  ;;  %v802_v19 = vmul.f32 %v1143_v58, %v1143_v58 }
 0x2b9   : > { %v777_v62 = vadd.f32 %v776_v56, %v762_v55  ;;  %v814_v27 = vadd.f32 %v813_v23, %v799_v57  ;;  %v763_v63 = vmul.f32 %v726_v60, %v408_v47  ;;  %v800_v5 = vmul.f32 %v726_v60, %v726_v60 }
 0x2bb   : > { %v778_v31 = vadd.f32 %v777_v62, %v763_v63  ;;  %v815_v14 = vadd.f32 %v814_v27, %v800_v5 }
 0x2bd   : > { %v779_v3 = vadd.f32 %v778_v31, %v764_v9  ;;  %v816_v4 = vadd.f32 %v815_v14, %v801_v12  ;;  %v1146_v34 = vpop.f32.mrb[12].mxu1 }
 0x2be   : > { %v739_v0 = vpop.f32.mrb[13].mxu1  ;;  %v768_v26 = vmul.f32 %v1146_v34, %v413_v7  ;;  %v805_v28 = vmul.f32 %v1146_v34, %v1146_v34 }
 0x2bf   : > { %v766_v13 = vmul.f32 %v739_v0, %v411_v8  ;;  %v780_v21 = vadd.f32 %v779_v3, %v765_v18  ;;  %v803_v1 = vmul.f32 %v739_v0, %v739_v0  ;;  %v817_v38 = vadd.f32 %v816_v4, %v802_v19  ;;  %v1147_v17 = vpop.f32.mrb[14].mxu1 }
 0x2c0   : > { %v742_v20 = vpop.f32.mrb[15].mxu1  ;;  %v769_v32 = vmul.f32 %v1147_v17, %v414_v6  ;;  %v806_v45 = vmul.f32 %v1147_v17, %v1147_v17 }
 0x2c1   : > { %v781_v24 = vadd.f32 %v780_v21, %v766_v13  ;;  %v818_v41 = vadd.f32 %v817_v38, %v803_v1  ;;  %v767_v25 = vmul.f32 %v742_v20, %v412_v15  ;;  %v804_v11 = vmul.f32 %v742_v20, %v742_v20 }
 0x2c3   : > { %v782_v29 = vadd.f32 %v781_v24, %v767_v25  ;;  %v819_v30 = vadd.f32 %v818_v41, %v804_v11 }
 0x2c5   : > { %v783_v16 = vadd.f32 %v782_v29, %v768_v26  ;;  %v820_v33 = vadd.f32 %v819_v30, %v805_v28 }
 0x2c7   : > { %v784_v35 = vadd.f32 %v783_v16, %v769_v32  ;;  %v821_v36 = vadd.f32 %v820_v33, %v806_v45 }
 0x2c9   : > { %v822_v37 = vrot.slane %v821_v36, 4  ;;  %v785_v48 = vrot.slane %v784_v35, 4 }
 0x2cb   : > { %v823_v2 = vadd.f32 %v822_v37, %v821_v36  ;;  %v786_v40 = vadd.f32 %v785_v48, %v784_v35 }
 0x2cd   : > { %v824_v61 = vrot.slane %v823_v2, 2  ;;  %v787_v44 = vrot.slane %v786_v40, 2 }
 0x2cf   : > { %v825_v39 = vadd.f32 %v824_v61, %v823_v2  ;;  %v788_v46 = vadd.f32 %v787_v44, %v786_v40 }
 0x2d1   : > { %v826_v42 = vrot.slane %v825_v39, 1  ;;  %v789_v47 = vrot.slane %v788_v46, 1 }
 0x2d3   : > { %v827_v43 = vadd.f32 %v826_v42, %v825_v39  ;;  %v790_v49 = vadd.f32 %v789_v47, %v788_v46 }
 0x2d5   : > { %v828_v10 = vmax.f32 %v827_v43, 1e-16 }
 0x2d7   : > { %1233 = vrsqrt.f32 %v828_v10 }
 0x2e1   : > { %v1234_v50 = vpop.eup %1233 }
 0x2e2   : > { %v830_v51 = vmul.f32 %v1234_v50, %v790_v49 }
 0x2e4   : > { %831 = vst [vmem:[%s239_s4] sm:$0x1] %v830_v51 }
 0x2e5   : > { %1336 = shalt.err (!%p1333_p7)
}
 0x2e6   : > { %s1337_s30 = scalar_lea.hbm %s1770_s20, 16  ;;  %s1341_s8 = scalar_lea.hbm %s1817_s3, 32 }
 0x2e7   : > { %p1338_p9 = scmp.ne.s32.totalorder %s1770_s20, %s1337_s30  ;;  %p1342_p8 = scmp.lt.u32.totalorder %s1770_s20, %s1817_s3 }
 0x2e8   : > { %p1343_p6 = scmp.lt.u32.totalorder %s1341_s8, %s1337_s30  ;;  %p1345_p4 = scmp.lt.u32.totalorder %s1337_s30, %s1770_s20 }
 0x2e9   : > { %p1339_p10 = pnand %p1338_p9, %p1837_p0 }
 0x2ea   : > { %p1344_p1 = por %p1343_p6, %p1342_p8 }
 0x2eb   : > { %p1340_p11 = pneg %p1339_p10 }
 0x2ec   : > { %p1346_p5 = por %p1345_p4, %p1344_p1 }
 0x2ee   : > { %p1347_p12 = pnand %p1346_p5, %p1340_p11 }
 0x2f0   : > { %1350 = shalt.err (!%p1347_p12)
}
 0x2f1   : > { %1156 = dma.vmem_to_hbm [thread:$0]  (%p1837_p0), %s1772_s10, 16, %s1770_s20, %s833_s9  }
 0x2f2 PF: > { %s857_s17 = sand.u32 1, %s1385_s12   ;;  %p1838_p2 = scmp.ne.s32.totalorder %s1826_s25, 0 }
 0x2f3   : > { %p1839_p3 = scmp.ge.s32.totalorder %s1397_s15, 2  ;;  %s858_s26 = scalar_lea.sflag [#allocation4], %s857_s17 }
 0x2f5   : > { %p1170_p13 = pnand %p1839_p3, %p1838_p2 }
 0x2f7   : > { %1380 = dma.done.wait (!%p1170_p13), %s858_s26, 16  }
 0x2f8   : > { %1382 = vsyncadd (!%p1170_p13), %s858_s26, 4294967280  ;;  %p19_p7 = scmp.ge.s32.totalorder %s1451_s18, 4   ;;  %s1840_s12 = smov %s1389_s13 }
 0x2f9   : > { %s1841_s13 = smov %s1393_s14  ;;  %s1842_s14 = smov %s1463_s21 }
 0x2fa   : > { %s1843_s15 = smov %s1451_s18  ;;  %21 = sbr.rel (!%p19_p7) target bundleno = 9 (0x9), region = 95 }
 0x301   :  { %862 = vsyncpa [#allocation3], 1 }
 0x302   :  { %864 = vsyncpa [#allocation3 + $0x1], 1 }
 0x303   :  { %865 = vsyncpa [#allocation6], 1 }
 0x304   :  { %867 = vsyncpa [#allocation6 + $0x1], 1 }
 0x305   :  { %868 = vsyncpa [#allocation4], 1 }
 0x306   :  { %870 = vsyncpa [#allocation4 + $0x1], 1 }

</bundles_post_ra>
